<compile_context>
chip_gen: v7x
topology: tpu7x:2x2x1
jax: 0.10.0
libtpu: 0.0.40
codegen_flags: <defaults>
</compile_context>

<pallas_src>
import functools

import jax
import jax.numpy as jnp
import numpy as np
from jax.experimental import pallas as pl
from jax.experimental.pallas import tpu as pltpu


def _rup(x, m):
    return -(-int(x) // m) * m


# ----------------------------- Pallas kernel ------------------------------ #
def _pathcon_fused_kernel(dat_ref, w_ref, out_ref, *, nh, S, rows_pad, d_ins,
                          d_outs, relu_flags, w_offs, wo_off, b_off, brows,
                          cat_dim):
    """Entire PathCon forward on one VMEM-resident working set."""
    f32, bf16 = jnp.float32, jnp.bfloat16
    hi = jax.lax.Precision.HIGHEST
    inv_s = 1.0 / float(S)
    d_rel = d_ins[0]

    # ---- in-kernel gather / mask prep (feature_type='id') --------------------
    # One-hot relation features via lane-iota == index (index == n_rel -> the null
    # zero row), masks as lane-broadcast columns.  Only raw int indices / 0-1
    # masks ever crossed HBM.
    feat, mask_col = [], []
    for h in range(nh):
        rp = rows_pad[h + 1]
        idx = dat_ref[0:rp, h:h + 1]                               # [rp, 1] int32
        lane = jax.lax.broadcasted_iota(jnp.int32, (rp, d_rel), 1)
        feat.append((lane == idx).astype(f32))                     # [rp, d_rel]
        mask_col.append(dat_ref[0:rp, nh + h:nh + h + 1].astype(f32))  # [rp, 1]

    # ---- block-diagonal masked-mean operators (1/S on each edge's S-sample block)
    binds = []
    for h in range(nh):
        ro, ri = rows_pad[h], rows_pad[h + 1]
        r = jax.lax.broadcasted_iota(jnp.int32, (ro, ri), 0)
        c = jax.lax.broadcasted_iota(jnp.int32, (ro, ri), 1)
        d = c - r * S
        binds.append(jnp.where((d >= 0) & (d < S), inv_s, 0.0))    # [ro, ri] f32

    biases = w_ref[b_off:b_off + brows, :]                         # [brows, 128]

    # ---- aggregator layers ----------------------------------------------------
    # Every masked mean is one MXU matmul; all hops of a layer share the weight,
    # so their aggregates are stacked into a single dot (one bias add / relu).
    vecs = [None] + feat       # vecs[k] = edge vectors at depth k; vecs[0] unused
    res = []
    for layer in range(nh):
        di, do = d_ins[layer], d_outs[layer]
        w = w_ref[w_offs[layer]:w_offs[layer] + di, 0:do]
        b = biases[layer:layer + 1, 0:do]
        aggs = []
        for hop in range(nh - layer):
            neigh = mask_col[hop] * vecs[hop + 1]                  # mask folded into neighbors
            if layer == 0:
                # operands are exactly representable (0/1 one-hots, 0/0.25 operator)
                # -> bf16 MXU pass is bit-exact and cheap on v6e/v7x.
                agg = jnp.dot(binds[hop].astype(bf16), neigh.astype(bf16),
                              preferred_element_type=f32)
            else:
                agg = jnp.dot(binds[hop], neigh,
                              preferred_element_type=f32, precision=hi)
            if not ((hop == 0 and layer == 0) or (layer == nh - 1)):
                agg = agg + vecs[hop]                              # self term
            aggs.append(agg)
        stacked = aggs[0] if len(aggs) == 1 else jnp.concatenate(aggs, axis=0)
        h_out = jnp.dot(stacked, w, preferred_element_type=f32, precision=hi) + b
        if relu_flags[layer]:
            h_out = jnp.maximum(h_out, 0.0)
        # split the stacked rows back into per-hop vectors (sublane-aligned slices)
        nxt, r0 = [], 0
        for hop in range(nh - layer):
            rp = rows_pad[hop]
            nxt.append(h_out[r0:r0 + rp, :])
            r0 += rp
        vecs = nxt
        res.append(vecs[0])            # == edge_vectors[0].squeeze(1)

    # ---- fused output Linear: single lane-dense dot, bias added once ----------
    res_cat = res[0] if nh == 1 else jnp.concatenate(res, axis=1)  # [rp0, cat_dim]
    wo = w_ref[wo_off:wo_off + cat_dim, :]                         # [cat_dim, 128]
    bo = biases[nh:nh + 1, :]                                      # [1, 128]
    out_ref[...] = jnp.dot(res_cat, wo, preferred_element_type=f32,
                           precision=hi) + bo


# ----------------------- one-time parameter packing ------------------------ #
def pack_pathcon_params(params, *, context_hops, neighbor_samples):
    """Pack all weights/biases into ONE lane-dense [K, 128] f32 slab (host-side,
    outside the jitted hot path) and collect static config."""
    nh = int(context_hops)
    aggs = params["aggregators"]
    assert len(aggs) == nh
    d_ins = tuple(int(np.shape(w)[0]) for (w, _, _) in aggs)
    d_outs = tuple(int(np.shape(w)[1]) for (w, _, _) in aggs)
    relu_flags = tuple(bool(r) for (_, _, r) in aggs)
    wo = np.asarray(params["output_w"], np.float32)
    bo = np.asarray(params["output_b"], np.float32)
    cat_dim = int(sum(d_outs))
    assert wo.shape[0] == cat_dim
    n_rel = int(wo.shape[1])
    lanes = _rup(max(n_rel, max(d_outs)), 128)

    # feature_type == 'id': relation features must be [eye(n_rel); zeros] so the
    # kernel can synthesize one-hot rows from raw indices (in-kernel gather).
    rel_feat = np.asarray(params["relation_features"], np.float32)
    d_rel = rel_feat.shape[1]
    assert d_rel == d_ins[0]
    expect = np.concatenate([np.eye(d_rel, dtype=np.float32),
                             np.zeros((1, d_rel), np.float32)], axis=0)
    assert rel_feat.shape == expect.shape and np.allclose(rel_feat, expect), \
        "only feature_type='id' is supported"
    # TODO(synk): feature_type 'bow'/'bert' -> pass rel_feat as a third VMEM slab
    # and gather in-kernel with a one-hot @ rel_feat MXU matmul.

    blocks, w_offs, off = [], [], 0
    for (w, _, _), di, do in zip(aggs, d_ins, d_outs):
        wp = np.zeros((_rup(di, 8), lanes), np.float32)
        wp[:di, :do] = np.asarray(w, np.float32)
        w_offs.append(off)
        blocks.append(wp)
        off += wp.shape[0]
    wo_off = off
    wop = np.zeros((_rup(cat_dim, 8), lanes), np.float32)
    wop[:cat_dim, :n_rel] = wo
    blocks.append(wop)
    off += wop.shape[0]
    b_off = off
    brows = _rup(nh + 1, 8)
    bp = np.zeros((brows, lanes), np.float32)
    for i, (_, b, _) in enumerate(aggs):
        bp[i, :d_outs[i]] = np.asarray(b, np.float32).reshape(-1)
    bp[nh, :n_rel] = bo.reshape(-1)
    blocks.append(bp)
    off += brows

    w_slab = jnp.asarray(np.concatenate(blocks, axis=0))
    cfg = dict(nh=nh, S=int(neighbor_samples), n_rel=n_rel, lanes=lanes,
               d_ins=d_ins, d_outs=d_outs, relu_flags=relu_flags,
               w_offs=tuple(w_offs), wo_off=wo_off, b_off=b_off, brows=brows,
               cat_dim=cat_dim)
    return w_slab, cfg


# -------------------------- PathCon forward (JAX) -------------------------- #
def pathcon_forward(cfg, w_slab, edge_list, mask_list, edge2relation):
    """Jitted hot path: build the tiny per-batch int32 data slab and run the one
    fused Pallas program.  `edge_list` is accepted for interface parity with
    PathCon.forward but is unused (layer-0/hop-0 excludes the self vector and
    deeper edges are fully described by `edge2relation`)."""
    del edge_list
    nh, S, n_rel = cfg["nh"], cfg["S"], cfg["n_rel"]
    bsz = int(mask_list[0].shape[0])
    rows = [bsz * S ** h for h in range(nh + 1)]
    rows_pad = tuple(_rup(r, 8) for r in rows)
    rmax_pad = rows_pad[nh]

    # one small int32 slab: nh index columns + nh mask columns
    cols = []
    for h in range(nh):
        idx = edge2relation[h].reshape(-1).astype(jnp.int32)
        cols.append(jnp.pad(idx, (0, rmax_pad - idx.shape[0]),
                            constant_values=n_rel))        # n_rel == null relation
    for h in range(nh):
        m = mask_list[h].reshape(-1).astype(jnp.int32)
        cols.append(jnp.pad(m, (0, rmax_pad - m.shape[0])))
    dat = jnp.stack(cols, axis=1)                           # [rmax_pad, 2*nh] int32

    kernel = functools.partial(
        _pathcon_fused_kernel, nh=nh, S=S, rows_pad=rows_pad,
        d_ins=cfg["d_ins"], d_outs=cfg["d_outs"], relu_flags=cfg["relu_flags"],
        w_offs=cfg["w_offs"], wo_off=cfg["wo_off"], b_off=cfg["b_off"],
        brows=cfg["brows"], cat_dim=cfg["cat_dim"])
    vmem = pl.BlockSpec(memory_space=pltpu.MemorySpace.VMEM)
    logits = pl.pallas_call(
        kernel,
        out_shape=jax.ShapeDtypeStruct((rows_pad[0], cfg["lanes"]), jnp.float32),
        in_specs=[vmem, vmem],
        out_specs=vmem,
    )(dat, w_slab)
    return logits[:bsz, :n_rel]


# ------------------------------ pure-JAX ref ------------------------------ #
def _ref_agg(self_v, neigh, masks, w, b, self_included, relu):
    ent = jnp.mean(neigh * masks, axis=-2)       # [B, E, 1, D_in]
    out = jnp.mean(ent, axis=-2)                 # [B, E, D_in]
    if self_included:
        out = out + self_v
    out = out @ w + b
    return jnp.maximum(out, 0.0) if relu else out


def ref_forward(params, edge_list, mask_list, edge2relation,
                *, context_hops, neighbor_samples):
    rel_feat = params["relation_features"]
    d_rel = rel_feat.shape[1]
    bsz = mask_list[0].shape[0]
    s = neighbor_samples
    edge_vectors = [jnp.take(rel_feat, edge_list[0], axis=0)[:, None, :]]
    for idx in range(len(edge_list) - 1):
        rels = edge2relation[idx]
        ev = jnp.take(rel_feat, rels.reshape(-1), axis=0).reshape(rels.shape + (d_rel,))
        edge_vectors.append(ev)
    res = []
    for i in range(context_hops):
        w, b, relu = params["aggregators"][i]
        d_in = w.shape[0]
        nxt = []
        for hop in range(context_hops - i):
            self_included = not ((hop == 0 and i == 0) or (i == context_hops - 1))
            neigh = edge_vectors[hop + 1].reshape(bsz, -1, 1, s, d_in)
            msk = mask_list[hop].reshape(bsz, -1, 1, s, 1)
            self_v = edge_vectors[hop].reshape(bsz, -1, d_in)
            nxt.append(_ref_agg(self_v, neigh, msk, w, b, self_included, relu))
        edge_vectors = nxt
        res.append(edge_vectors[0][:, 0, :])
    res = jnp.concatenate(res, axis=1)
    return res @ params["output_w"] + params["output_b"]


# --------------------------------- setup ----------------------------------- #
def xavier_linear(key, d_in, d_out):
    kw, kb = jax.random.split(key)
    bound_w = float(np.sqrt(6.0 / (d_in + d_out)))
    w = jax.random.uniform(kw, (d_in, d_out), jnp.float32, -bound_w, bound_w)
    bound_b = float(1.0 / np.sqrt(d_in))
    b = jax.random.uniform(kb, (d_out,), jnp.float32, -bound_b, bound_b)
    return w, b


if __name__ == "__main__":
    B, S, H, HID, NREL = 2, 4, 2, 32, 16   # batch, neighbor_samples, context_hops, dim, n_relations
    key = jax.random.PRNGKey(0)
    k = jax.random.split(key, 10)

    # parameters (feature_type='id': relation features = eye + null row)
    rel_feat = jnp.concatenate(
        [jnp.eye(NREL, dtype=jnp.float32), jnp.zeros((1, NREL), jnp.float32)], axis=0)
    w0, b0 = xavier_linear(k[0], NREL, HID)       # aggregator 0: relation_dim -> hidden, relu
    w1, b1 = xavier_linear(k[1], HID, HID)        # aggregator 1: hidden -> hidden, identity
    wo, bo = xavier_linear(k[2], HID * H, NREL)   # output layer
    params = {
        "relation_features": rel_feat,
        "aggregators": [(w0, b0, True), (w1, b1, False)],
        "output_w": wo,
        "output_b": bo,
    }

    # synthetic batch (tail side only, as in forward())
    edge0 = jax.random.randint(k[3], (B,), 0, NREL + 1, dtype=jnp.int32)
    edge1 = jax.random.randint(k[4], (B, S), 0, NREL + 1, dtype=jnp.int32)      # placeholder (unused)
    edge2 = jax.random.randint(k[5], (B, S, S), 0, NREL + 1, dtype=jnp.int32)   # placeholder (unused)
    e2r0 = jax.random.randint(k[6], (B, S), 0, NREL + 1, dtype=jnp.int32)
    e2r1 = jax.random.randint(k[7], (B, S, S), 0, NREL + 1, dtype=jnp.int32)
    mask0 = jax.random.bernoulli(k[8], 0.7, (B, S)).astype(jnp.float32)
    mask1 = jax.random.bernoulli(k[9], 0.7, (B, S, S)).astype(jnp.float32)

    edge_list = [edge0, edge1, edge2]
    mask_list = [mask0, mask1]
    edge2relation = [e2r0, e2r1]

    # one-time weight packing (outside the jitted hot path)
    w_slab, cfg = pack_pathcon_params(params, context_hops=H, neighbor_samples=S)

    fwd = jax.jit(functools.partial(pathcon_forward, cfg))
    logits = jax.block_until_ready(fwd(w_slab, edge_list, mask_list, edge2relation))

    # high-precision reference (in-kernel learned-value dots run at Precision.HIGHEST;
    # the layer-0 bf16 aggregation is bit-exact, so agreement is ~1e-6 in practice).
    with jax.default_matmul_precision("highest"):
        ref = ref_forward(params, edge_list, mask_list, edge2relation,
                          context_hops=H, neighbor_samples=S)
    assert logits.shape == (B, NREL), logits.shape
    np.testing.assert_allclose(np.asarray(logits), np.asarray(ref),
                               rtol=1e-3, atol=1e-3)
    print("KERNEL_OK")
</pallas_src>

<mosaic_0001>
module attributes {stable_mosaic.version = 11 : i64} {
  func.func @_pathcon_fused_kernel(%arg0: memref<32x4xi32, #tpu.memory_space<vmem>>, %arg1: memref<120x128xf32, #tpu.memory_space<vmem>>, %arg2: memref<8x128xf32, #tpu.memory_space<vmem>>) attributes {dimension_semantics = [], scalar_prefetch = 0 : i64, scratch_operands = 0 : i64, tpu.core_type = #tpu.core_type<tc>} {
    %c0 = arith.constant 0 : index
    %c0_0 = arith.constant 0 : index
    %0 = vector.load %arg0[%c0, %c0_0] : memref<32x4xi32, #tpu.memory_space<vmem>>, vector<8x1xi32>
    %1 = tpu.iota {dimensions = array<i32: 1>} : vector<8x16xi32>
    %2 = vector.broadcast %0 : vector<8x1xi32> to vector<8x16xi32>
    %3 = arith.cmpi eq, %1, %2 : vector<8x16xi32>
    %4 = arith.extui %3 : vector<8x16xi1> to vector<8x16xi32>
    %5 = arith.sitofp %4 : vector<8x16xi32> to vector<8x16xf32>
    %c0_1 = arith.constant 0 : index
    %c2 = arith.constant 2 : index
    %6 = vector.load %arg0[%c0_1, %c2] : memref<32x4xi32, #tpu.memory_space<vmem>>, vector<8x1xi32>
    %7 = arith.sitofp %6 : vector<8x1xi32> to vector<8x1xf32>
    %c0_2 = arith.constant 0 : index
    %c1 = arith.constant 1 : index
    %8 = vector.load %arg0[%c0_2, %c1] : memref<32x4xi32, #tpu.memory_space<vmem>>, vector<32x1xi32>
    %9 = tpu.iota {dimensions = array<i32: 1>} : vector<32x16xi32>
    %10 = vector.broadcast %8 : vector<32x1xi32> to vector<32x16xi32>
    %11 = arith.cmpi eq, %9, %10 : vector<32x16xi32>
    %12 = arith.extui %11 : vector<32x16xi1> to vector<32x16xi32>
    %13 = arith.sitofp %12 : vector<32x16xi32> to vector<32x16xf32>
    %c0_3 = arith.constant 0 : index
    %c3 = arith.constant 3 : index
    %14 = vector.load %arg0[%c0_3, %c3] : memref<32x4xi32, #tpu.memory_space<vmem>>, vector<32x1xi32>
    %15 = arith.sitofp %14 : vector<32x1xi32> to vector<32x1xf32>
    %16 = tpu.iota {dimensions = array<i32: 0>} : vector<8x8xi32>
    %17 = tpu.iota {dimensions = array<i32: 1>} : vector<8x8xi32>
    %c4_i32 = arith.constant 4 : i32
    %18 = vector.broadcast %c4_i32 : i32 to vector<8x8xi32>
    %19 = arith.muli %16, %18 : vector<8x8xi32>
    %20 = arith.subi %17, %19 : vector<8x8xi32>
    %c0_i32 = arith.constant 0 : i32
    %21 = vector.broadcast %c0_i32 : i32 to vector<8x8xi32>
    %22 = arith.cmpi sge, %20, %21 : vector<8x8xi32>
    %c4_i32_4 = arith.constant 4 : i32
    %23 = vector.broadcast %c4_i32_4 : i32 to vector<8x8xi32>
    %24 = arith.cmpi slt, %20, %23 : vector<8x8xi32>
    %25 = arith.andi %22, %24 : vector<8x8xi1>
    %cst = arith.constant 2.500000e-01 : f32
    %cst_5 = arith.constant 0.000000e+00 : f32
    %26 = vector.broadcast %cst : f32 to vector<8x8xf32>
    %27 = vector.broadcast %cst_5 : f32 to vector<8x8xf32>
    %28 = arith.select %25, %26, %27 : vector<8x8xi1>, vector<8x8xf32>
    %29 = tpu.iota {dimensions = array<i32: 0>} : vector<8x32xi32>
    %30 = tpu.iota {dimensions = array<i32: 1>} : vector<8x32xi32>
    %c4_i32_6 = arith.constant 4 : i32
    %31 = vector.broadcast %c4_i32_6 : i32 to vector<8x32xi32>
    %32 = arith.muli %29, %31 : vector<8x32xi32>
    %33 = arith.subi %30, %32 : vector<8x32xi32>
    %c0_i32_7 = arith.constant 0 : i32
    %34 = vector.broadcast %c0_i32_7 : i32 to vector<8x32xi32>
    %35 = arith.cmpi sge, %33, %34 : vector<8x32xi32>
    %c4_i32_8 = arith.constant 4 : i32
    %36 = vector.broadcast %c4_i32_8 : i32 to vector<8x32xi32>
    %37 = arith.cmpi slt, %33, %36 : vector<8x32xi32>
    %38 = arith.andi %35, %37 : vector<8x32xi1>
    %cst_9 = arith.constant 2.500000e-01 : f32
    %cst_10 = arith.constant 0.000000e+00 : f32
    %39 = vector.broadcast %cst_9 : f32 to vector<8x32xf32>
    %40 = vector.broadcast %cst_10 : f32 to vector<8x32xf32>
    %41 = arith.select %38, %39, %40 : vector<8x32xi1>, vector<8x32xf32>
    %c112 = arith.constant 112 : index
    %c0_11 = arith.constant 0 : index
    %42 = vector.load %arg1[%c112, %c0_11] : memref<120x128xf32, #tpu.memory_space<vmem>>, vector<8x128xf32>
    %c0_12 = arith.constant 0 : index
    %c0_13 = arith.constant 0 : index
    %43 = vector.load %arg1[%c0_12, %c0_13] : memref<120x128xf32, #tpu.memory_space<vmem>>, vector<16x32xf32>
    %44 = vector.extract_strided_slice %42 {offsets = [0, 0], sizes = [1, 32], strides = [1, 1]} : vector<8x128xf32> to vector<1x32xf32>
    %45 = vector.broadcast %7 : vector<8x1xf32> to vector<8x16xf32>
    %46 = arith.mulf %45, %5 : vector<8x16xf32>
    %47 = arith.truncf %28 : vector<8x8xf32> to vector<8x8xbf16>
    %48 = arith.truncf %46 : vector<8x16xf32> to vector<8x16xbf16>
    %cst_14 = arith.constant dense<0.000000e+00> : vector<8x16xf32>
    %49 = tpu.matmul %47, %48, %cst_14 {dimension_numbers = #tpu.dot_dimension_numbers<[1], [0], [0], [1], [0, 0, 1, 1], [], []>} : vector<8x8xbf16>, vector<8x16xbf16>, vector<8x16xf32> -> vector<8x16xf32>
    %50 = vector.broadcast %15 : vector<32x1xf32> to vector<32x16xf32>
    %51 = arith.mulf %50, %13 : vector<32x16xf32>
    %52 = arith.truncf %41 : vector<8x32xf32> to vector<8x32xbf16>
    %53 = arith.truncf %51 : vector<32x16xf32> to vector<32x16xbf16>
    %cst_15 = arith.constant dense<0.000000e+00> : vector<8x16xf32>
    %54 = tpu.matmul %52, %53, %cst_15 {dimension_numbers = #tpu.dot_dimension_numbers<[1], [0], [0], [1], [0, 0, 1, 1], [], []>} : vector<8x32xbf16>, vector<32x16xbf16>, vector<8x16xf32> -> vector<8x16xf32>
    %55 = arith.addf %54, %5 : vector<8x16xf32>
    %56 = tpu.concatenate %49, %55 in 0 : vector<8x16xf32>, vector<8x16xf32> -> vector<16x16xf32>
    %cst_16 = arith.constant dense<0.000000e+00> : vector<16x32xf32>
    %57 = tpu.matmul %56, %43, %cst_16 {dimension_numbers = #tpu.dot_dimension_numbers<[1], [0], [0], [1], [0, 0, 1, 1], [], []>, precision = #tpu.contract_precision<fp32>} : vector<16x16xf32>, vector<16x32xf32>, vector<16x32xf32> -> vector<16x32xf32>
    %58 = vector.broadcast %44 : vector<1x32xf32> to vector<16x32xf32>
    %59 = arith.addf %57, %58 : vector<16x32xf32>
    %cst_17 = arith.constant 0.000000e+00 : f32
    %60 = vector.broadcast %cst_17 : f32 to vector<16x32xf32>
    %61 = arith.maximumf %59, %60 : vector<16x32xf32>
    %62 = vector.extract_strided_slice %61 {offsets = [0, 0], sizes = [8, 32], strides = [1, 1]} : vector<16x32xf32> to vector<8x32xf32>
    %63 = vector.extract_strided_slice %61 {offsets = [8, 0], sizes = [8, 32], strides = [1, 1]} : vector<16x32xf32> to vector<8x32xf32>
    %c16 = arith.constant 16 : index
    %c0_18 = arith.constant 0 : index
    %64 = vector.load %arg1[%c16, %c0_18] : memref<120x128xf32, #tpu.memory_space<vmem>>, vector<32x32xf32>
    %65 = vector.extract_strided_slice %42 {offsets = [1, 0], sizes = [1, 32], strides = [1, 1]} : vector<8x128xf32> to vector<1x32xf32>
    %66 = vector.broadcast %7 : vector<8x1xf32> to vector<8x32xf32>
    %67 = arith.mulf %66, %63 : vector<8x32xf32>
    %cst_19 = arith.constant dense<0.000000e+00> : vector<8x32xf32>
    %68 = tpu.matmul %28, %67, %cst_19 {dimension_numbers = #tpu.dot_dimension_numbers<[1], [0], [0], [1], [0, 0, 1, 1], [], []>, precision = #tpu.contract_precision<fp32>} : vector<8x8xf32>, vector<8x32xf32>, vector<8x32xf32> -> vector<8x32xf32>
    %cst_20 = arith.constant dense<0.000000e+00> : vector<8x32xf32>
    %69 = tpu.matmul %68, %64, %cst_20 {dimension_numbers = #tpu.dot_dimension_numbers<[1], [0], [0], [1], [0, 0, 1, 1], [], []>, precision = #tpu.contract_precision<fp32>} : vector<8x32xf32>, vector<32x32xf32>, vector<8x32xf32> -> vector<8x32xf32>
    %70 = vector.broadcast %65 : vector<1x32xf32> to vector<8x32xf32>
    %71 = arith.addf %69, %70 : vector<8x32xf32>
    %72 = tpu.concatenate %62, %71 in 1 : vector<8x32xf32>, vector<8x32xf32> -> vector<8x64xf32>
    %c48 = arith.constant 48 : index
    %c0_21 = arith.constant 0 : index
    %73 = vector.load %arg1[%c48, %c0_21] : memref<120x128xf32, #tpu.memory_space<vmem>>, vector<64x128xf32>
    %74 = vector.extract_strided_slice %42 {offsets = [2, 0], sizes = [1, 128], strides = [1, 1]} : vector<8x128xf32> to vector<1x128xf32>
    %cst_22 = arith.constant dense<0.000000e+00> : vector<8x128xf32>
    %75 = tpu.matmul %72, %73, %cst_22 {dimension_numbers = #tpu.dot_dimension_numbers<[1], [0], [0], [1], [0, 0, 1, 1], [], []>, precision = #tpu.contract_precision<fp32>} : vector<8x64xf32>, vector<64x128xf32>, vector<8x128xf32> -> vector<8x128xf32>
    %76 = vector.broadcast %74 : vector<1x128xf32> to vector<8x128xf32>
    %77 = arith.addf %75, %76 : vector<8x128xf32>
    %c0_23 = arith.constant 0 : index
    %c0_24 = arith.constant 0 : index
    %78 = vector.load %arg2[%c0_23, %c0_24] : memref<8x128xf32, #tpu.memory_space<vmem>>, vector<8x128xf32>
    tpu.vector_store %arg2[%c0_23, %c0_24], %77 {strides = array<i32>} : memref<8x128xf32, #tpu.memory_space<vmem>>, vector<8x128xf32>,
    return
  }
}

</mosaic_0001>

<bundles_post_ra>
// kernel: pathcon_forward.1
= control target key start
LH: loop header
LB: loop body
LE: loop exit
PB: predicated region body
PF: predicated region fallthrough
CT: control target
= control target key end

     0   :  { %7 = vsyncpa [#allocation3], 0  ;;  %s2847_s9 = smov [#allocation2]   ;;  %s3110_s0 = inlined_call_operand.vmem [shape: s32[32,4], index: 0, kind: input, shape index: {}]   ;;  %s3111_s1 = inlined_call_operand.hbm [shape: f32[120,128], index: 1, kind: input, shape index: {}]   ;;  %s3112_s2 = inlined_call_operand.vmem [shape: f32[8,128], index: 2, kind: output, shape index: {}]  }
   0x1   :  { %s15_s10 = sshll.u32 %s2847_s9, 4  ;;  %s2823_s13 = scalar_lea.hbm %s3111_s1, 1920  ;;  %s16_s10 = int_to_ptr.vmem [resolvable:$true] %s15_s10 }
   0x2   :  { %p2824_p0 = scmp.ne.s32.totalorder %s3111_s1, %s2823_s13  ;;  %p2827_p1 = scmp.lt.u32.totalorder %s2823_s13, %s3111_s1 }
   0x4   :  { %p2829_p2 = pnand %p2827_p1, %p2824_p0 }
   0x6   :  { %2832 = shalt.err (!%p2829_p2)
}
   0x7   :  { %s2833_s18 = scalar_lea.vmem %s16_s10, 1920  ;;  %p2838_p4 = scmp.lt.s32.totalorder %s16_s10, %s16_s10 }
   0x8   :  { %p2834_p3 = scmp.ne.s32.totalorder %s16_s10, %s2833_s18  ;;  %p2839_p5 = scmp.lt.s32.totalorder %s2833_s18, %s2833_s18 }
   0xa   :  { %p2840_p6 = por %p2839_p5, %p2838_p4 }
   0xc   :  { %p2841_p7 = pnand %p2840_p6, %p2834_p3 }
   0xe   :  { %2844 = shalt.err (!%p2841_p7)
}
   0xf   :  { %s2848_s19 = smov 128   ;;  %s2849_s20 = smov 8  }
  0x10   :  { %21 = dma.hbm_to_vmem [thread:$0]  %s3111_s1, 1920, %s16_s10, [#allocation3], %s2848_s19, %s2848_s19, %s2849_s20  }
  0x11   :  { %2845 = dma.done.wait [#allocation3], 1920  }
  0x12   :  { %2846 = vsyncadd [#allocation3], 4294965376  ;;  %v2850_v0 = vmov 1   ;;  %v2851_v1 = vmov 0   ;;  %v36_v2 = vld [vmem:[%s3110_s0] sm:$0xff]  ;;  %v37_v4 = vld [vmem:[%s3110_s0 + $0x8] sm:$0xff]  ;;  %v27_v13 = vlaneseq }
  0x13   :  { %2817 = vset.pattern.permute.xlu1 %v2850_v0  ;;  %2816 = vset.pattern.permute.xlu0 %v2851_v1  ;;  %v64_v3 = vcvt.s32.f32 %v36_v2  ;;  %v2852_v5 = vmov 0.0   ;;  %v2853_v6 = vmov 2   ;;  %v65_v7 = vcvt.s32.f32 %v37_v4  ;;  %v38_v8 = vld [vmem:[%s3110_s0 + $0x10] sm:$0xff]  ;;  %v39_v11 = vld [vmem:[%s3110_s0 + $0x18] sm:$0xff]  ;;  %v77_v44 = vld [vmem:[#allocation2] sm:$0xff]  ;;  %s2857_s0 = smov 32  }
  0x14   :  { %41 = vperm.xlu1 %2817, %v36_v2   ;;  %30 = vperm.xlu0 %2816, %v36_v2   ;;  %v2854_v9 = vmov 3   ;;  %v66_v10 = vcvt.s32.f32 %v38_v8  ;;  %vm2855_vm0 = vmmov 0   ;;  %v67_v12 = vcvt.s32.f32 %v39_v11  ;;  %v78_v45 = vld [vmem:[#allocation2 + $0x8] sm:$0xff] }
  0x15   :  { %2364 = vmatprep.subr.bf16.mxu0 %v2852_v5  ;;  %2420 = vmatprep.subr.mxu1 %v2852_v5  ;;  %v2903_v14 = vshrl.u32 %v27_v13, 7  ;;  %v28_v16 = vand.u32 127, %v27_v13  ;;  %vm91_vm7 = vcmask 1043456   ;;  %vm87_vm8 = vcmask 64512  }
  0x16   :  { %2366 = vmatprep.mubr.msk.bf16.mxu0 %vm2855_vm0, %v2852_v5  ;;  %2422 = vmatprep.mubr.msk.f32.mxu1 %vm2855_vm0, %v2852_v5  ;;  %vm161_vm11 = vcmask 261120   ;;  %v216_v46 = vand.u32 4294901760, %v77_v44  ;;  %v219_v47 = vand.u32 4294901760, %v78_v45  ;;  %vm208_vm12 = vcmask 130048  }
  0x17   :  { %v70_v15 = vmul.u32 4, %v2903_v14  ;;  %vm1682_vm13 = vcmask 523264  }
  0x18   :  { %44 = vperm.xlu1 %2817, %v37_v4   ;;  %2818 = vset.pattern.permute.xlu0 %v2853_v6  ;;  %v2630_v48 = vpack.c.bf16 %v219_v47, %v216_v46  ;;  %v304_v49 = vsub.f32 %v77_v44, %v216_v46  ;;  %v311_v50 = vsub.f32 %v78_v45, %v219_v47  ;;  %v2856_v46 = vmov 0.0|0.0   ;;  %v721_v47 = vld [vmem:[#allocation2 + $0x20] sm:$0xff] }
  0x19   :  { %81 = vperm.xlu0 %2818, %v64_v3   ;;  %v71_v17 = vsub.s32 %v28_v16, %v70_v15 }
  0x1a   :  { %v305_v51 = vand.u32 4294901760, %v304_v49  ;;  %v312_v52 = vand.u32 4294901760, %v311_v50  ;;  %v2638_v58 = vpack.c.bf16 %v311_v50, %v304_v49 }
  0x1b   :  { %vm72_vm2 = vcmp.ge.s32.totalorder %v71_v17, 0  ;;  %vm73_vm3 = vcmp.lt.s32.totalorder %v71_v17, 4 }
  0x1c   :  { %2819 = vset.pattern.permute.xlu1 %v2854_v9  ;;  %vm74_vm4 = vmand %vm72_vm2, %vm73_vm3  ;;  %v306_v53 = vsub.f32 %v304_v49, %v305_v51  ;;  %v313_v54 = vsub.f32 %v311_v50, %v312_v52  ;;  %v2646_v59 = vpack.c.bf16 %v312_v52, %v305_v51 }
  0x1d   :  { %137 = vperm.xlu1 %2819, %v64_v3   ;;  %2820 = vset.pattern.permute.xlu0 %v2854_v9  ;;  %v2914_v24 = vsel %vm74_vm4, 0.25, %v2852_v5 }
  0x1e   :  { %142 = vperm.xlu0 %2820, %v65_v7   ;;  %v85_v32 = vpack.c.bf16 %v2914_v24, %v2914_v24  ;;  %v307_v55 = vand.u32 4294901760, %v306_v53  ;;  %v314_v56 = vand.u32 4294901760, %v313_v54 }
  0x20   :  { %v2634_v57 = vpack.c.bf16 %v314_v56, %v307_v55 }
  0x21   :  { %2821 = vset.pattern.permute.xlu1 %v2850_v0 }
  0x22   :  { %47 = vperm.xlu1 %2821, %v38_v8   ;;  %147 = vperm.xlu0 %2820, %v66_v10  }
  0x26   :  { %50 = vperm.xlu1 %2821, %v39_v11  }
  0x2a   :  { %2822 = vset.pattern.permute.xlu1 %v2854_v9 }
  0x2b   :  { %152 = vperm.xlu1 %2822, %v67_v12  }
  0x93   :  { %v42_v18 = vpop.permute.xlu1 %41  ;;  %v31_v19 = vpop.permute.xlu0 %30 }
  0x94   :  { %vm32_vm1 = vcmp.eq.s32.totalorder %v28_v16, %v31_v19  ;;  %vm52_vm5 = vcmp.eq.s32.totalorder %v28_v16, %v42_v18  ;;  %v725_v19 = vsel %vm87_vm8, %v2914_v24, 0 }
  0x95   :  { %v2907_v20 = vsel %vm32_vm1, 1.0, %v2852_v5  ;;  %v2230_v26 = vsel %vm52_vm5, 1.0, %v2852_v5 }
  0x97   :  { %v45_v21 = vpop.permute.xlu1 %44 }
  0x98   :  { %v2909_v22 = vpop.permute.xlu0 %81  ;;  %vm53_vm6 = vcmp.eq.s32.totalorder %v28_v16, %v45_v21  ;;  %v2936_v21 = vld [vmem:[#allocation2 + $0x70] sm:$0xff] }
  0x99   :  { %v84_v23 = vmul.f32 %v2907_v20, %v2909_v22  ;;  %v2231_v29 = vsel %vm53_vm6, 1.0, %v2852_v5 }
  0x9b   :  { %v86_v25 = vpack.c.bf16 %v84_v23, %v84_v23  ;;  %v794_v23 = vsub.f32 %v725_v19, %v725_v19  ;;  %v1672_v19 = vld [vmem:[#allocation2 + $0x40] sm:$0xff] }
  0x9c   :  { %v138_v27 = vpop.permute.xlu1 %137 }
  0x9d   :  { %v155_v28 = vmul.f32 %v2230_v26, %v138_v27  ;;  %v143_v30 = vpop.permute.xlu0 %142  ;;  %v93_v31 = vsel %vm91_vm7, %v86_v25, 0  ;;  %v795_v26 = vand.u32 4294901760, %v794_v23 }
  0x9e   :  { %v156_v33 = vmul.f32 %v2231_v29, %v143_v30  ;;  %2365 = vmatpush3.bf16.msra.mxu0 %v93_v31 }
  0x9f   :  { %2370 = vmatprep.subr.bf16.mxu0 %v2852_v5  ;;  %v796_v31 = vsub.f32 %v794_v23, %v795_v26 }
  0xa0   :  { %v159_v34 = vpack.c.bf16 %v156_v33, %v155_v28 }
  0xa1   :  { %v48_v35 = vpop.permute.xlu1 %47  ;;  %2367 = vmatmul.mubr.msk.bf16.vlgmr.msra.gmra.mrb[0].mxu0 %vm87_vm8, %v85_v32  ;;  %v148_v38 = vpop.permute.xlu0 %147 }
  0xa2   :  { %2371 = vmatpush3.bf16.msra.mxu0 %v159_v34  ;;  %2374 = vmatprep.mubr.msk.bf16.mxu0 %vm2855_vm0, %v2852_v5  ;;  %vm54_vm9 = vcmp.eq.s32.totalorder %v28_v16, %v48_v35  ;;  %v797_v34 = vand.u32 4294901760, %v796_v31 }
  0xa3   :  { %2372 = vmatprep.subr.bf16.mxu0 %v2852_v5  ;;  %v2232_v37 = vsel %vm54_vm9, 1.0, %v2852_v5 }
  0xa4   :  { %v157_v41 = vmul.f32 %v2232_v37, %v148_v38 }
  0xa5   :  { %v51_v36 = vpop.permute.xlu1 %50 }
  0xa6   :  { %vm55_vm10 = vcmp.eq.s32.totalorder %v28_v16, %v51_v36 }
  0xa7   :  { %v2233_v39 = vsel %vm55_vm10, 1.0, %v2852_v5 }
  0xaa   :  { %v153_v40 = vpop.permute.xlu1 %152 }
  0xab   :  { %v158_v42 = vmul.f32 %v2233_v39, %v153_v40  ;;  %v720_v40 = vld [vmem:[#allocation2 + $0x18] sm:$0xff] }
  0xad   :  { %v160_v43 = vpack.c.bf16 %v158_v42, %v157_v41  ;;  %v1184_v42 = vand.u32 4294901760, %v720_v40 }
  0xaf   :  { %2373 = vmatpush3.bf16.msra.mxu0 %v160_v43  ;;  %v1268_v45 = vsub.f32 %v720_v40, %v1184_v42 }
  0xb0   :  { %2631 = vmatprep.subr.bf16.mxu0 %v2630_v48 }
  0xb1   :  { %v1269_v51 = vand.u32 4294901760, %v1268_v45 }
  0xb2   :  { %2375 = vmatmul.mubr.msk.bf16.vlgmr.msra.gmra.mrb[4].mxu0 %vm161_vm11, %v85_v32 }
  0xb3   :  { %2633 = vmatpush3.bf16.msra.mxu0 %v2630_v48  ;;  %v1270_v56 = vsub.f32 %v1268_v45, %v1269_v51 }
  0xb4   :  { %2635 = vmatprep.subr.bf16.mxu0 %v2634_v57 }
 0x174   :  { %v129_v60 = vpop.f32.mrb[0].mxu0 }
 0x175   :  { %v210_v61 = vsel %vm208_vm12, %v129_v60, 0  ;;  %v2368_v62 = vpop.f32.mrb[1].mxu0  ;;  %v1271_v60 = vand.u32 4294901760, %v1270_v56 }
 0x176   :  { %v282_v63 = vand.u32 4294901760, %v210_v61  ;;  %v132_v0 = vpop.f32.mrb[2].mxu0 }
 0x177   :  { %v2369_v1 = vpop.f32.mrb[3].mxu0 }
 0x178   :  { %v283_v2 = vsub.f32 %v210_v61, %v282_v63 }
 0x17a   :  { %v284_v3 = vand.u32 4294901760, %v283_v2 }
 0x17c   :  { %v285_v4 = vsub.f32 %v283_v2, %v284_v3 }
 0x17e   :  { %v286_v6 = vand.u32 4294901760, %v285_v4 }
 0x180   :  { %2382 = vmatprep.mubr.f32.mxu0 %v286_v6 }
 0x185   :  { %v198_v7 = vpop.f32.mrb[4].mxu0 }
 0x186   :  { %v199_v8 = vadd.f32 %v2907_v20, %v198_v7  ;;  %v2376_v9 = vpop.f32.mrb[5].mxu0  ;;  %v206_v20 = vsub.s32 0, %v2903_v14 }
 0x187   :  { %v201_v10 = vpop.f32.mrb[6].mxu0 }
 0x188   :  { %v213_v11 = vsel %vm208_vm12, %v199_v8, 0  ;;  %v2377_v12 = vpop.f32.mrb[7].mxu0  ;;  %v207_v25 = vrot.slane %v2936_v21, %v206_v20 }
 0x189   :  { %v292_v13 = vand.u32 4294901760, %v213_v11 }
 0x18b   :  { %v293_v15 = vsub.f32 %v213_v11, %v292_v13 }
 0x18d   :  { %v294_v16 = vand.u32 4294901760, %v293_v15 }
 0x18f   :  { %v295_v17 = vsub.f32 %v293_v15, %v294_v16 }
 0x191   :  { %v296_v18 = vand.u32 4294901760, %v295_v17  ;;  %v1670_v17 = vld [vmem:[#allocation2 + $0x30] sm:$0xff] }
 0x192   :  { %v1687_v20 = vand.u32 4294901760, %v1670_v17 }
 0x193   :  { %2383 = vmatmul.mubr.f32.vlgmr.msra.gmra.mrb[8].mxu0 %v296_v18  ;;  %v1671_v18 = vld [vmem:[#allocation2 + $0x38] sm:$0xff] }
 0x194   :  { %2389 = vmatprep.mubr.f32.mxu0 %v282_v63  ;;  %2637 = vmatpush3.bf16.msra.mxu0 %v2634_v57 }
 0x195   :  { %2639 = vmatprep.subr.bf16.mxu0 %v2638_v58 }
 0x19b   :  { %2390 = vmatmul.mubr.f32.vlgmr.msra.gmra.mrb[8].mxu0 %v292_v13 }
 0x19c   :  { %2396 = vmatprep.mubr.f32.mxu0 %v283_v2  ;;  %2641 = vmatpush3.bf16.msra.mxu0 %v2638_v58 }
 0x19d   :  { %2643 = vmatprep.subr.bf16.mxu0 %v2630_v48 }
 0x1a3   :  { %2397 = vmatmul.mubr.f32.vlgmr.msra.gmra.mrb[8].mxu0 %v293_v15 }
 0x1a4   :  { %2403 = vmatprep.mubr.f32.mxu0 %v284_v3  ;;  %2645 = vmatpush3.bf16.msra.mxu0 %v2630_v48 }
 0x1a5   :  { %2647 = vmatprep.subr.bf16.mxu0 %v2646_v59 }
 0x1ab   :  { %2404 = vmatmul.mubr.f32.vlgmr.msra.gmra.mrb[8].mxu0 %v294_v16 }
 0x1ac   :  { %2410 = vmatprep.mubr.f32.mxu0 %v282_v63  ;;  %2649 = vmatpush3.bf16.msra.mxu0 %v2646_v59 }
 0x1ad   :  { %2651 = vmatprep.subr.bf16.mxu0 %v2630_v48 }
 0x1b3   :  { %2411 = vmatmul.mubr.f32.vlgmr.msra.gmra.mrb[8].mxu0 %v292_v13 }
 0x1b4   :  { %2417 = vmatprep.mubr.f32.mxu0 %v282_v63  ;;  %2653 = vmatpush3.bf16.msra.mxu0 %v2630_v48  ;;  %v722_v48 = vld [vmem:[#allocation2 + $0x28] sm:$0xff] }
 0x1b5   :  { %2654 = vmatprep.subr.bf16.mxu0 %v2856_v46  ;;  %v1190_v49 = vand.u32 4294901760, %v722_v48 }
 0x1b7   :  { %v1282_v54 = vsub.f32 %v722_v48, %v1190_v49 }
 0x1b9   :  { %v1283_v59 = vand.u32 4294901760, %v1282_v54 }
 0x1bb   :  { %2418 = vmatmul.mubr.f32.vlgmr.msra.gmra.mrb[8].mxu0 %v292_v13  ;;  %v1284_v62 = vsub.f32 %v1282_v54, %v1283_v59 }
 0x1bc   :  { %2458 = vmatprep.mubr.msk.f32.mxu0 %vm2855_vm0, %v2852_v5 }
 0x1bd   :  { %v1285_v1 = vand.u32 4294901760, %v1284_v62 }
 0x28e   :  { %v2419_v27 = vpop.f32.mrb[8].mxu0 }
 0x28f   :  { %v2762_v28 = vadd.f32 %v2419_v27, %v207_v25  ;;  %v707_v29 = vpop.f32.mrb[9].mxu0  ;;  %v1674_v27 = vld [vmem:[#allocation2 + $0x50] sm:$0xff] }
 0x290   :  { %v2939_v30 = vadd.f32 %v707_v29, %v207_v25  ;;  %v1673_v25 = vld [vmem:[#allocation2 + $0x48] sm:$0xff]  ;;  %v1699_v31 = vand.u32 4294901760, %v1674_v27 }
 0x291   :  { %v718_v32 = vmax.f32 %v2762_v28, 0.0  ;;  %v1675_v28 = vld [vmem:[#allocation2 + $0x58] sm:$0xff]  ;;  %v1696_v29 = vand.u32 4294901760, %v1673_v25 }
 0x293   :  { %v723_v33 = vmul.f32 %v718_v32, %v2909_v22  ;;  %v719_v22 = vld [vmem:[#allocation2 + $0x10] sm:$0xff]  ;;  %v1702_v32 = vand.u32 4294901760, %v1675_v28 }
 0x294   :  { %v1181_v41 = vand.u32 4294901760, %v719_v22 }
 0x295   :  { %v728_v35 = vand.u32 4294901760, %v723_v33 }
 0x296   :  { %v2965_v43 = vpack.c.bf16 %v1184_v42, %v1181_v41  ;;  %v1261_v44 = vsub.f32 %v719_v22, %v1181_v41 }
 0x297   :  { %v805_v36 = vsub.f32 %v723_v33, %v728_v35  ;;  %2421 = vmatpush3.msra.mxu1 %v728_v35  ;;  %v2997_v33 = vsub.f32 %v1670_v17, %v1687_v20 }
 0x298   :  { %2423 = vmatmul.mubr.f32.vlgmr.msra.gmra.mrb[0].mxu1 %v797_v34  ;;  %2425 = vmatprep.subr.mxu1 %v2852_v5  ;;  %v1262_v50 = vand.u32 4294901760, %v1261_v44  ;;  %v2667_v3 = vpack.c.bf16 %v1268_v45, %v1261_v44 }
 0x299   :  { %v806_v37 = vand.u32 4294901760, %v805_v36  ;;  %2427 = vmatprep.mubr.msk.f32.mxu1 %vm2855_vm0, %v2852_v5  ;;  %2656 = vmatpush3.bf16.msra.mxu0 %v2965_v43  ;;  %v1772_v22 = vand.u32 4294901760, %v2997_v33 }
 0x29a   :  { %2657 = vmatprep.subr.bf16.mxu0 %v2856_v46  ;;  %v1263_v55 = vsub.f32 %v1261_v44, %v1262_v50  ;;  %v2679_v6 = vpack.c.bf16 %v1269_v51, %v1262_v50 }
 0x29b   :  { %v807_v38 = vsub.f32 %v805_v36, %v806_v37  ;;  %v1773_v45 = vsub.f32 %v2997_v33, %v1772_v22 }
 0x29c   :  { %v1264_v57 = vand.u32 4294901760, %v1263_v55 }
 0x29d   :  { %v808_v39 = vand.u32 4294901760, %v807_v38  ;;  %v3007_v38 = vsub.f32 %v1674_v27, %v1699_v31  ;;  %v1774_v50 = vand.u32 4294901760, %v1773_v45 }
 0x29e   :  { %v2661_v63 = vpack.c.bf16 %v1271_v60, %v1264_v57  ;;  %v1676_v60 = vld [vmem:[#allocation2 + $0x60] sm:$0xff] }
 0x29f   :  { %2426 = vmatpush3.msra.mxu1 %v808_v39  ;;  %v3009_v39 = vsub.f32 %v1675_v28, %v1702_v32  ;;  %v1705_v62 = vand.u32 4294901760, %v1676_v60 }
 0x2a0   :  { %2428 = vmatmul.mubr.msk.f32.vlgmr.msra.gmra.mrb[0].mxu1 %vm87_vm8, %v2914_v24  ;;  %2430 = vmatprep.subr.mxu1 %v2852_v5 }
 0x2a1   :  { %2431 = vmatpush3.msra.mxu1 %v805_v36  ;;  %2432 = vmatprep.mubr.msk.f32.mxu1 %vm2855_vm0, %v2852_v5  ;;  %v1807_v44 = vand.u32 4294901760, %v3009_v39 }
 0x2a2   :  { %2435 = vmatprep.subr.mxu1 %v2852_v5 }
 0x2a8   :  { %2433 = vmatmul.mubr.f32.vlgmr.msra.gmra.mrb[0].mxu1 %v794_v23  ;;  %v1690_v23 = vand.u32 4294901760, %v1671_v18 }
 0x2a9   :  { %2436 = vmatpush3.msra.mxu1 %v728_v35  ;;  %2437 = vmatprep.mubr.msk.f32.mxu1 %vm2855_vm0, %v2852_v5 }
 0x2aa   :  { %2440 = vmatprep.subr.mxu1 %v2852_v5  ;;  %v2999_v34 = vsub.f32 %v1671_v18, %v1690_v23  ;;  %v3003_v36 = vpack.c.bf16 %v1690_v23, %v1687_v20  ;;  %v717_v23 = vmax.f32 %v2939_v30, 0.0 }
 0x2ac   :  { %v1779_v40 = vand.u32 4294901760, %v2999_v34  ;;  %v2715_v28 = vpack.c.bf16 %v2999_v34, %v2997_v33 }
 0x2b0   :  { %2438 = vmatmul.mubr.f32.vlgmr.msra.gmra.mrb[0].mxu1 %v795_v26  ;;  %v1693_v26 = vand.u32 4294901760, %v1672_v19 }
 0x2b1   :  { %2441 = vmatpush3.msra.mxu1 %v806_v37  ;;  %2442 = vmatprep.mubr.msk.f32.mxu1 %vm2855_vm0, %v2852_v5  ;;  %v3005_v37 = vsub.f32 %v1673_v25, %v1696_v29 }
 0x2b2   :  { %2445 = vmatprep.subr.mxu1 %v2852_v5 }
 0x2b3   :  { %v1793_v42 = vand.u32 4294901760, %v3005_v37 }
 0x2b8   :  { %2443 = vmatmul.mubr.msk.f32.vlgmr.msra.gmra.mrb[0].mxu1 %vm87_vm8, %v2914_v24 }
 0x2b9   :  { %2446 = vmatpush3.msra.mxu1 %v728_v35  ;;  %2447 = vmatprep.mubr.msk.f32.mxu1 %vm2855_vm0, %v2852_v5  ;;  %v3001_v35 = vsub.f32 %v1672_v19, %v1693_v26 }
 0x2ba   :  { %2702 = vmatprep.subr.bf16.mxu1 %v2856_v46 }
 0x2bb   :  { %v1786_v41 = vand.u32 4294901760, %v3001_v35 }
 0x2bd   :  { %v1787_v48 = vsub.f32 %v3001_v35, %v1786_v41 }
 0x2c0   :  { %2448 = vmatmul.mubr.msk.f32.vlgmr.msra.gmra.mrb[0].mxu1 %vm87_vm8, %v2914_v24  ;;  %v1187_v24 = vand.u32 4294901760, %v721_v47 }
 0x2c1   :  { %2551 = vmatprep.mubr.msk.f32.mxu1 %vm2855_vm0, %v2852_v5 }
 0x2c2   :  { %v2658_v52 = vpack.c.bf16 %v1190_v49, %v1187_v24  ;;  %v1275_v53 = vsub.f32 %v721_v47, %v1187_v24  ;;  %v1780_v47 = vsub.f32 %v2999_v34, %v1779_v40  ;;  %v1794_v24 = vsub.f32 %v3005_v37, %v1793_v42 }
 0x2c4   :  { %2659 = vmatpush3.bf16.msra.mxu0 %v2658_v52  ;;  %v1276_v58 = vand.u32 4294901760, %v1275_v53  ;;  %v2670_v4 = vpack.c.bf16 %v1282_v54, %v1275_v53  ;;  %v1781_v51 = vand.u32 4294901760, %v1780_v47  ;;  %v1795_v54 = vand.u32 4294901760, %v1794_v24 }
 0x2c5   :  { %2660 = vmatprep.subr.bf16.mxu0 %v2856_v46  ;;  %v2721_v47 = vpack.c.bf16 %v3009_v39, %v3007_v38  ;;  %v2739_v24 = vpack.c.bf16 %v1779_v40, %v1772_v22 }
 0x2c6   :  { %v1277_v61 = vsub.f32 %v1275_v53, %v1276_v58  ;;  %v2682_v7 = vpack.c.bf16 %v1283_v59, %v1276_v58  ;;  %v1808_v53 = vsub.f32 %v3009_v39, %v1807_v44  ;;  %v2703_v55 = vpack.c.bf16 %v1781_v51, %v1774_v50 }
 0x2c8   :  { %v1278_v0 = vand.u32 4294901760, %v1277_v61  ;;  %2704 = vmatpush3.bf16.msra.mxu1 %v2703_v55  ;;  %v1809_v58 = vand.u32 4294901760, %v1808_v53  ;;  %v1677_v61 = vld [vmem:[#allocation2 + $0x68] sm:$0xff] }
 0x2c9   :  { %2705 = vmatprep.subr.bf16.mxu1 %v2856_v46 }
 0x2ca   :  { %v2664_v2 = vpack.c.bf16 %v1285_v1, %v1278_v0  ;;  %v1813_v0 = vsub.f32 %v1676_v60, %v1705_v62 }
 0x393   :  { %v1169_v8 = vpop.f32.mrb[0].mxu1 }
 0x394   :  { %v1178_v9 = vsel %vm161_vm11, %v1169_v8, 0  ;;  %v2449_v10 = vpop.f32.mrb[1].mxu1 }
 0x395   :  { %v1249_v11 = vand.u32 4294901760, %v1178_v9  ;;  %v3040_v10 = vpack.c.bf16 %v1696_v29, %v1693_v26 }
 0x397   :  { %v1250_v12 = vsub.f32 %v1178_v9, %v1249_v11 }
 0x399   :  { %v1251_v13 = vand.u32 4294901760, %v1250_v12 }
 0x39b   :  { %v1252_v15 = vsub.f32 %v1250_v12, %v1251_v13 }
 0x39d   :  { %v1253_v16 = vand.u32 4294901760, %v1252_v15 }
 0x39f   :  { %2459 = vmatmul.mubr.f32.vlgmr.msra.gmra.mrb[10].mxu0 %v1253_v16 }
 0x3a0   :  { %2662 = vmatpush3.bf16.msra.mxu0 %v2661_v63  ;;  %2469 = vmatprep.mubr.msk.f32.mxu0 %vm2855_vm0, %v2852_v5  ;;  %v1708_v63 = vand.u32 4294901760, %v1677_v61 }
 0x3a1   :  { %2663 = vmatprep.subr.bf16.mxu0 %v2856_v46 }
 0x3a2   :  { %v1820_v1 = vsub.f32 %v1677_v61, %v1708_v63  ;;  %v3051_v15 = vpack.c.bf16 %v1708_v63, %v1705_v62 }
 0x3a4   :  { %2665 = vmatpush3.bf16.msra.mxu0 %v2664_v2  ;;  %v1814_v2 = vand.u32 4294901760, %v1813_v0  ;;  %v2724_v19 = vpack.c.bf16 %v1820_v1, %v1813_v0 }
 0x3a5   :  { %2666 = vmatprep.subr.bf16.mxu0 %v2856_v46 }
 0x3a7   :  { %2470 = vmatmul.mubr.f32.vlgmr.msra.gmra.mrb[10].mxu0 %v1249_v11 }
 0x3a8   :  { %2668 = vmatpush3.bf16.msra.mxu0 %v2667_v3  ;;  %2480 = vmatprep.mubr.msk.f32.mxu0 %vm2855_vm0, %v2852_v5  ;;  %v1821_v3 = vand.u32 4294901760, %v1820_v1 }
 0x3a9   :  { %2669 = vmatprep.subr.bf16.mxu0 %v2856_v46 }
 0x3aa   :  { %v2748_v20 = vpack.c.bf16 %v1821_v3, %v1814_v2 }
 0x3ac   :  { %2671 = vmatpush3.bf16.msra.mxu0 %v2670_v4  ;;  %v1815_v4 = vsub.f32 %v1813_v0, %v1814_v2 }
 0x3ad   :  { %2672 = vmatprep.subr.bf16.mxu0 %v2856_v46 }
 0x3af   :  { %2481 = vmatmul.mubr.f32.vlgmr.msra.gmra.mrb[10].mxu0 %v1250_v12  ;;  %v3046_v12 = vpack.c.bf16 %v1702_v32, %v1699_v31  ;;  %v2718_v32 = vpack.c.bf16 %v3005_v37, %v3001_v35 }
 0x3b0   :  { %2674 = vmatpush3.bf16.msra.mxu0 %v2965_v43  ;;  %2491 = vmatprep.mubr.msk.f32.mxu0 %vm2855_vm0, %v2852_v5 }
 0x3b1   :  { %2675 = vmatprep.subr.bf16.mxu0 %v2856_v46 }
 0x3b4   :  { %2677 = vmatpush3.bf16.msra.mxu0 %v2658_v52 }
 0x3b5   :  { %2678 = vmatprep.subr.bf16.mxu0 %v2856_v46 }
 0x3b7   :  { %2492 = vmatmul.mubr.f32.vlgmr.msra.gmra.mrb[10].mxu0 %v1251_v13 }
 0x3b8   :  { %2680 = vmatpush3.bf16.msra.mxu0 %v2679_v6  ;;  %2502 = vmatprep.mubr.msk.f32.mxu0 %vm2855_vm0, %v2852_v5  ;;  %v1822_v6 = vsub.f32 %v1820_v1, %v1821_v3 }
 0x3b9   :  { %2681 = vmatprep.subr.bf16.mxu0 %v2856_v46 }
 0x3ba   :  { %v1823_v8 = vand.u32 4294901760, %v1822_v6 }
 0x3bc   :  { %2683 = vmatpush3.bf16.msra.mxu0 %v2682_v7  ;;  %v1816_v7 = vand.u32 4294901760, %v1815_v4 }
 0x3bd   :  { %2684 = vmatprep.subr.bf16.mxu0 %v2856_v46 }
 0x3be   :  { %v2712_v9 = vpack.c.bf16 %v1823_v8, %v1816_v7 }
 0x3bf   :  { %2503 = vmatmul.mubr.f32.vlgmr.msra.gmra.mrb[10].mxu0 %v1249_v11 }
 0x3c0   :  { %2686 = vmatpush3.bf16.msra.mxu0 %v2965_v43  ;;  %2513 = vmatprep.mubr.msk.f32.mxu0 %vm2855_vm0, %v2852_v5  ;;  %v1800_v43 = vand.u32 4294901760, %v3007_v38 }
 0x3c1   :  { %2687 = vmatprep.subr.bf16.mxu0 %v2856_v46 }
 0x3c2   :  { %v1801_v49 = vsub.f32 %v3007_v38, %v1800_v43  ;;  %v2745_v33 = vpack.c.bf16 %v1807_v44, %v1800_v43 }
 0x3c4   :  { %2689 = vmatpush3.bf16.msra.mxu0 %v2658_v52  ;;  %v1788_v52 = vand.u32 4294901760, %v1787_v48  ;;  %v1802_v57 = vand.u32 4294901760, %v1801_v49  ;;  %v2742_v49 = vpack.c.bf16 %v1793_v42, %v1786_v41 }
 0x3c5   :  { %2690 = vmatprep.subr.bf16.mxu0 %v2856_v46 }
 0x3c6   :  { %v2706_v56 = vpack.c.bf16 %v1795_v54, %v1788_v52  ;;  %v2709_v59 = vpack.c.bf16 %v1809_v58, %v1802_v57 }
 0x3c7   :  { %2514 = vmatmul.mubr.f32.vlgmr.msra.gmra.mrb[10].mxu0 %v1249_v11  ;;  %v1175_v11 = vsub.s32 1, %v2903_v14 }
 0x3c8   :  { %2532 = vmatprep.mubr.msk.f32.mxu0 %vm2855_vm0, %v2852_v5  ;;  %2692 = vmatpush3.bf16.msra.mxu0 %v3003_v36 }
 0x3c9   :  { %2693 = vmatprep.subr.bf16.mxu0 %v2856_v46  ;;  %2707 = vmatpush3.bf16.msra.mxu1 %v2706_v56  ;;  %v1176_v13 = vrot.slane %v2936_v21, %v1175_v11 }
 0x3ca   :  { %2708 = vmatprep.subr.bf16.mxu1 %v2856_v46 }
 0x3cc   :  { %2695 = vmatpush3.bf16.msra.mxu0 %v3040_v10 }
 0x3cd   :  { %2710 = vmatpush3.bf16.msra.mxu1 %v2709_v59  ;;  %2696 = vmatprep.subr.bf16.mxu0 %v2856_v46 }
 0x3ce   :  { %2711 = vmatprep.subr.bf16.mxu1 %v2856_v46 }
 0x3d0   :  { %2698 = vmatpush3.bf16.msra.mxu0 %v3046_v12 }
 0x3d1   :  { %2713 = vmatpush3.bf16.msra.mxu1 %v2712_v9  ;;  %2699 = vmatprep.subr.bf16.mxu0 %v2856_v46 }
 0x3d2   :  { %2714 = vmatprep.subr.bf16.mxu1 %v2856_v46 }
 0x3d4   :  { %2701 = vmatpush3.bf16.msra.mxu0 %v3051_v15 }
 0x49a   :  { %v1661_v16 = vpop.f32.mrb[10].mxu0 }
 0x49b   :  { %v2764_v17 = vadd.f32 %v1661_v16, %v1176_v13  ;;  %v2515_v18 = vpop.f32.mrb[11].mxu0 }
 0x49d   :  { %1666 = vrot.lane.b32.xlu0 %v2764_v17, %s2857_s0 }
 0x50f   :  { %v1667_v25 = vpop.permute.xlu0 %1666 }
 0x510   :  { %v1669_v26 = vsel %vm161_vm11, %v717_v23, %v1667_v25 }
 0x511   :  { %v1684_v27 = vsel %vm1682_vm13, %v1669_v26, 0 }
 0x512   :  { %v1759_v29 = vand.u32 4294901760, %v1684_v27 }
 0x514   :  { %v1760_v31 = vsub.f32 %v1684_v27, %v1759_v29  ;;  %2552 = vmatmul.mubr.f32.vlgmr.msra.gmra.mrb[2].mxu1 %v1759_v29 }
 0x515   :  { %2716 = vmatpush3.bf16.msra.mxu1 %v2715_v28  ;;  %2570 = vmatprep.mubr.msk.f32.mxu1 %vm2855_vm0, %v2852_v5 }
 0x516   :  { %v1761_v45 = vand.u32 4294901760, %v1760_v31  ;;  %2717 = vmatprep.subr.bf16.mxu1 %v2856_v46 }
 0x518   :  { %v1762_v30 = vsub.f32 %v1760_v31, %v1761_v45 }
 0x519   :  { %2719 = vmatpush3.bf16.msra.mxu1 %v2718_v32 }
 0x51a   :  { %2720 = vmatprep.subr.bf16.mxu1 %v2856_v46  ;;  %v1763_v48 = vand.u32 4294901760, %v1762_v30 }
 0x51c   :  { %2533 = vmatmul.mubr.f32.vlgmr.msra.gmra.mrb[12].mxu0 %v1763_v48 }
 0x51d   :  { %2722 = vmatpush3.bf16.msra.mxu1 %v2721_v47 }
 0x51e   :  { %2723 = vmatprep.subr.bf16.mxu1 %v2856_v46 }
 0x521   :  { %2725 = vmatpush3.bf16.msra.mxu1 %v2724_v19 }
 0x522   :  { %2726 = vmatprep.subr.bf16.mxu1 %v2856_v46 }
 0x524   :  { %2571 = vmatmul.mubr.f32.vlgmr.msra.gmra.mrb[2].mxu1 %v1760_v31 }
 0x525   :  { %2728 = vmatpush3.bf16.msra.mxu1 %v3003_v36  ;;  %2589 = vmatprep.mubr.msk.f32.mxu1 %vm2855_vm0, %v2852_v5 }
 0x526   :  { %2729 = vmatprep.subr.bf16.mxu1 %v2856_v46 }
 0x529   :  { %2731 = vmatpush3.bf16.msra.mxu1 %v3040_v10 }
 0x52a   :  { %2732 = vmatprep.subr.bf16.mxu1 %v2856_v46 }
 0x52d   :  { %2734 = vmatpush3.bf16.msra.mxu1 %v3046_v12 }
 0x52e   :  { %2735 = vmatprep.subr.bf16.mxu1 %v2856_v46 }
 0x531   :  { %2737 = vmatpush3.bf16.msra.mxu1 %v3051_v15 }
 0x532   :  { %2738 = vmatprep.subr.bf16.mxu1 %v2856_v46 }
 0x534   :  { %2590 = vmatmul.mubr.f32.vlgmr.msra.gmra.mrb[2].mxu1 %v1761_v45 }
 0x535   :  { %2740 = vmatpush3.bf16.msra.mxu1 %v2739_v24  ;;  %2608 = vmatprep.mubr.msk.f32.mxu1 %vm2855_vm0, %v2852_v5 }
 0x536   :  { %2741 = vmatprep.subr.bf16.mxu1 %v2856_v46 }
 0x539   :  { %2743 = vmatpush3.bf16.msra.mxu1 %v2742_v49 }
 0x53a   :  { %2744 = vmatprep.subr.bf16.mxu1 %v2856_v46 }
 0x53d   :  { %2746 = vmatpush3.bf16.msra.mxu1 %v2745_v33 }
 0x53e   :  { %2747 = vmatprep.subr.bf16.mxu1 %v2856_v46 }
 0x541   :  { %2749 = vmatpush3.bf16.msra.mxu1 %v2748_v20 }
 0x542   :  { %2750 = vmatprep.subr.bf16.mxu1 %v2856_v46 }
 0x544   :  { %2609 = vmatmul.mubr.f32.vlgmr.msra.gmra.mrb[2].mxu1 %v1759_v29 }
 0x545   :  { %2752 = vmatpush3.bf16.msra.mxu1 %v3003_v36  ;;  %2627 = vmatprep.mubr.msk.f32.mxu1 %vm2855_vm0, %v2852_v5  ;;  %v1680_v36 = vsub.s32 2, %v2903_v14 }
 0x546   :  { %2753 = vmatprep.subr.bf16.mxu1 %v2856_v46 }
 0x547   :  { %v1681_v37 = vrot.slane %v2936_v21, %v1680_v36 }
 0x549   :  { %2755 = vmatpush3.bf16.msra.mxu1 %v3040_v10 }
 0x54a   :  { %2756 = vmatprep.subr.bf16.mxu1 %v2856_v46 }
 0x54d   :  { %2758 = vmatpush3.bf16.msra.mxu1 %v3046_v12 }
 0x54e   :  { %2759 = vmatprep.subr.bf16.mxu1 %v2856_v46 }
 0x551   :  { %2761 = vmatpush3.bf16.msra.mxu1 %v3051_v15 }
 0x554   :  { %2628 = vmatmul.mubr.f32.vlgmr.msra.gmra.mrb[2].mxu1 %v1759_v29 }
 0x5ef   :  { %v1765_v34 = vpop.f32.mrb[12].mxu0 }
 0x5f0   :  { %v2534_v35 = vpop.f32.mrb[13].mxu0  ;;  %v1766_v5 = vadd.f32 %v1765_v34, %v1681_v37 }
 0x627   :  { %v2219_v38 = vpop.f32.mrb[2].mxu1 }
 0x628   :  { %v2766_v39 = vadd.f32 %v2219_v38, %v1766_v5  ;;  %v2629_v22 = vpop.f32.mrb[3].mxu1 }
 0x62a   :  { %2223 = vst [vmem:[%s3112_s2] sm:$0xff] %v2766_v39 }
 0x62b   :  { %2228 = vsyncpa [#allocation3], 1 }

</bundles_post_ra>
